<compile_context>
chip_gen: v6e
topology: v6e:2x2x1
jax: 0.10.0
libtpu: 0.0.40
codegen_flags: <defaults>
</compile_context>

<pallas_src>
import jax
import jax.numpy as jnp
from jax import lax
from jax.experimental import pallas as pl
from jax.experimental.pallas import tpu as pltpu

EPS = 1e-5
HEAD_LANES = 128      # lane-dense fused head / output width
N_ACTIONS = 5         # q columns 0..4
LEV_COL = 5           # leverage column in head / output slab


def _strategy_kernel(x_ref, w1_ref, b1_ref, w2_ref, b2_ref, wh_ref, bh_ref, out_ref):
    x = x_ref[...]                       # (Bt, in+1) f32; last col = exp(-pred_std)
    exp_neg_pstd = x[:, -1:]             # (Bt, 1) f32

    # fc1 (+folded BN1) -> ReLU   (dropout = identity in eval)
    h = jnp.dot(x.astype(jnp.bfloat16), w1_ref[...],
                preferred_element_type=jnp.float32) + b1_ref[...]
    h = jnp.maximum(h, 0.0)

    # fc2 (+folded BN2) -> ReLU   (dropout = identity in eval)
    h = jnp.dot(h.astype(jnp.bfloat16), w2_ref[...],
                preferred_element_type=jnp.float32) + b2_ref[...]
    h = jnp.maximum(h, 0.0)

    # fused heads (dueling combination already folded into the weights):
    # one lane-padded matmul -> (Bt, 128): cols 0..4 = q, col 5 = leverage raw
    head = jnp.dot(h.astype(jnp.bfloat16), wh_ref[...],
                   preferred_element_type=jnp.float32) + bh_ref[...]

    col = lax.broadcasted_iota(jnp.int32, head.shape, 1)
    lev_full = jax.nn.softplus(head) * exp_neg_pstd        # valid on col 5

    # single unmasked lane-dense store: [q(5) | lev(1) | zeros]
    out_ref[...] = jnp.where(col < N_ACTIONS, head,
                             jnp.where(col == LEV_COL, lev_full, 0.0))


def _round_up(n, m):
    return ((n + m - 1) // m) * m


def pack_params(params, input_size, hidden_size):
    """Fold BN into fc weights/biases, fold the dueling combination and fuse +
    lane-pad the heads, cast MXU operands to bf16. Done once, outside the
    kernel."""
    f32 = jnp.float32

    s1 = params["g1"] * lax.rsqrt(params["v1"] + EPS)              # (1, H)
    w1 = params["w1"] * s1                                          # (in, H)
    b1 = (params["b1"] - params["m1"]) * s1 + params["be1"]         # (1, H)

    s2 = params["g2"] * lax.rsqrt(params["v2"] + EPS)
    w2 = params["w2"] * s2                                          # (H, H)
    b2 = (params["b2"] - params["m2"]) * s2 + params["be2"]

    # extra zero row so the appended exp(-pred_std) column of x is ignored by fc1
    w1 = jnp.concatenate([w1, jnp.zeros((1, hidden_size), f32)], axis=0)

    # dueling head folded at pack time:
    #   q[:, j] = h @ (Wa[:, j] - mean_j(Wa) + Wv) + (ba[j] - mean(ba) + bv)
    wq = params["wa"] - jnp.mean(params["wa"], axis=1, keepdims=True) + params["wv"]
    bq = params["ba"] - jnp.mean(params["ba"], axis=1, keepdims=True) + params["bv"]

    # fused, lane-padded heads: cols [0:5]=q, [5]=leverage raw
    wh = jnp.zeros((hidden_size, HEAD_LANES), f32)
    wh = wh.at[:, 0:N_ACTIONS].set(wq)
    wh = wh.at[:, LEV_COL:LEV_COL + 1].set(params["wl"])
    bh = jnp.zeros((1, HEAD_LANES), f32)
    bh = bh.at[:, 0:N_ACTIONS].set(bq)
    bh = bh.at[:, LEV_COL:LEV_COL + 1].set(params["bl"])

    return dict(
        w1=w1.astype(jnp.bfloat16), b1=b1.astype(f32),
        w2=w2.astype(jnp.bfloat16), b2=b2.astype(f32),
        wh=wh.astype(jnp.bfloat16), bh=bh.astype(f32),
    )


def improved_strategy_forward(x, packed, pred_std=None, *, block_batch=512):
    """Whole forward pass in one Pallas kernel, tiled over batch."""
    B, in_feats = x.shape
    H = packed["w2"].shape[0]
    xin = in_feats + 1                       # + exp(-pred_std) column

    # batch tile: multiple of 8 sublanes; weights stay resident across tiles
    bt = min(_round_up(B, 8), _round_up(block_batch, 8))
    b_pad = _round_up(B, bt)

    if pred_std is not None:
        last = jnp.exp(-jnp.reshape(pred_std, (B, 1)).astype(jnp.float32))
    else:
        last = jnp.ones((B, 1), jnp.float32)
    xp = jnp.concatenate([x.astype(jnp.float32), last], axis=1)
    if b_pad > B:
        xp = jnp.pad(xp, ((0, b_pad - B), (0, 0)))

    out = pl.pallas_call(
        _strategy_kernel,
        out_shape=jax.ShapeDtypeStruct((b_pad, HEAD_LANES), jnp.float32),
        grid=(b_pad // bt,),
        in_specs=[
            pl.BlockSpec((bt, xin), lambda i: (i, 0)),          # x (+exp(-pstd))
            pl.BlockSpec((xin, H), lambda i: (0, 0)),           # w1 (bf16)
            pl.BlockSpec((1, H), lambda i: (0, 0)),             # b1
            pl.BlockSpec((H, H), lambda i: (0, 0)),             # w2 (bf16)
            pl.BlockSpec((1, H), lambda i: (0, 0)),             # b2
            pl.BlockSpec((H, HEAD_LANES), lambda i: (0, 0)),    # fused heads (bf16)
            pl.BlockSpec((1, HEAD_LANES), lambda i: (0, 0)),    # fused head bias
        ],
        out_specs=pl.BlockSpec((bt, HEAD_LANES), lambda i: (i, 0)),
        compiler_params=pltpu.CompilerParams(
            dimension_semantics=("parallel",)),
    )(xp, packed["w1"], packed["b1"], packed["w2"], packed["b2"],
      packed["wh"], packed["bh"])

    q = out[:B, :N_ACTIONS]
    lev = out[:B, LEV_COL]
    return q, lev


# ---------------- deterministic parameter construction ----------------

def _orthogonal(key, out_features, in_features):
    """Mimics nn.init.orthogonal_ for a (out, in) weight matrix."""
    rows, cols = out_features, in_features
    flat = jax.random.normal(key, (max(rows, cols), min(rows, cols)), jnp.float32)
    q, r = jnp.linalg.qr(flat)
    q = q * jnp.sign(jnp.diag(r))
    if rows < cols:
        q = q.T
    return q[:rows, :cols]


def make_params(key, input_size=3, hidden_size=64):
    ks = jax.random.split(key, 9)

    def linear(k, out_f, in_f):
        w = _orthogonal(k, out_f, in_f)                  # PyTorch (out, in)
        return w.T, jnp.zeros((1, out_f), jnp.float32)   # stored (in, out)

    w1, b1 = linear(ks[0], hidden_size, input_size)
    w2, b2 = linear(ks[1], hidden_size, hidden_size)
    wa, ba = linear(ks[2], 5, hidden_size)
    wv, bv = linear(ks[3], 1, hidden_size)
    wl, bl = linear(ks[4], 1, hidden_size)

    def bn(kg, kb, km, kv):
        return dict(
            g=jax.random.uniform(kg, (1, hidden_size), jnp.float32, 0.5, 1.5),
            be=0.1 * jax.random.normal(kb, (1, hidden_size), jnp.float32),
            m=0.1 * jax.random.normal(km, (1, hidden_size), jnp.float32),
            v=jax.random.uniform(kv, (1, hidden_size), jnp.float32, 0.5, 1.5),
        )
    bn1 = bn(ks[5], ks[6], ks[7], ks[8])
    bn2 = bn(ks[8], ks[7], ks[6], ks[5])

    return dict(
        w1=w1, b1=b1, g1=bn1["g"], be1=bn1["be"], m1=bn1["m"], v1=bn1["v"],
        w2=w2, b2=b2, g2=bn2["g"], be2=bn2["be"], m2=bn2["m"], v2=bn2["v"],
        wa=wa, ba=ba, wv=wv, bv=bv, wl=wl, bl=bl,
    )


def reference_forward(x, params, pred_std=None):
    """Pure-JAX f32 reference (eval-mode PyTorch semantics)."""
    def bn(h, g, be, m, v):
        return (h - m) * (g * lax.rsqrt(v + EPS)) + be
    h = x @ params["w1"] + params["b1"]
    h = jnp.maximum(bn(h, params["g1"], params["be1"], params["m1"], params["v1"]), 0.0)
    h = h @ params["w2"] + params["b2"]
    h = jnp.maximum(bn(h, params["g2"], params["be2"], params["m2"], params["v2"]), 0.0)
    adv = h @ params["wa"] + params["ba"]
    val = h @ params["wv"] + params["bv"]
    q = val + (adv - jnp.mean(adv, axis=1, keepdims=True))
    lev = jax.nn.softplus(h @ params["wl"] + params["bl"])
    if pred_std is not None:
        lev = lev * jnp.exp(-jnp.reshape(pred_std, (-1, 1)))
    return q, lev[:, 0]


if __name__ == "__main__":
    key = jax.random.PRNGKey(0)
    k_param, k_x, k_std = jax.random.split(key, 3)

    input_size, hidden_size, batch = 3, 64, 8
    raw_params = make_params(k_param, input_size, hidden_size)
    packed = pack_params(raw_params, input_size, hidden_size)
    x = jax.random.normal(k_x, (batch, input_size), jnp.float32)

    # pred_std=None path (module default)
    q_val, lev = improved_strategy_forward(x, packed, pred_std=None)
    jax.block_until_ready((q_val, lev))
    assert q_val.shape == (batch, 5) and lev.shape == (batch,)
    q_ref, lev_ref = reference_forward(x, raw_params, pred_std=None)
    assert jnp.allclose(q_val, q_ref, rtol=5e-2, atol=5e-2)
    assert jnp.allclose(lev, lev_ref, rtol=5e-2, atol=5e-2)

    # pred_std path
    pred_std = jax.random.uniform(k_std, (batch, 1), jnp.float32)
    q_val2, lev2 = improved_strategy_forward(x, packed, pred_std=pred_std)
    jax.block_until_ready((q_val2, lev2))
    assert q_val2.shape == (batch, 5) and lev2.shape == (batch,)
    q_ref2, lev_ref2 = reference_forward(x, raw_params, pred_std=pred_std)
    assert jnp.allclose(q_val2, q_ref2, rtol=5e-2, atol=5e-2)
    assert jnp.allclose(lev2, lev_ref2, rtol=5e-2, atol=5e-2)

    print("KERNEL_OK")
</pallas_src>

<mosaic_0001>
module attributes {stable_mosaic.version = 11 : i64} {
  func.func @_strategy_kernel(%arg0: i32, %arg1: memref<8x4xf32, #tpu.memory_space<vmem>>, %arg2: memref<4x64xbf16, #tpu.memory_space<vmem>>, %arg3: memref<1x64xf32, #tpu.memory_space<vmem>>, %arg4: memref<64x64xbf16, #tpu.memory_space<vmem>>, %arg5: memref<1x64xf32, #tpu.memory_space<vmem>>, %arg6: memref<64x128xbf16, #tpu.memory_space<vmem>>, %arg7: memref<1x128xf32, #tpu.memory_space<vmem>>, %arg8: memref<8x128xf32, #tpu.memory_space<vmem>>) attributes {dimension_semantics = [#tpu.dimension_semantics<parallel>], iteration_bounds = array<i64: 1>, scalar_prefetch = 0 : i64, scratch_operands = 0 : i64, tpu.core_type = #tpu.core_type<tc>, window_params = [{transform_indices = @transform_0, window_bounds = array<i64: 8, 4>}, {pipeline_mode = #tpu.pipeline_mode<synchronous>, transform_indices = @transform_1, window_bounds = array<i64: 4, 64>}, {pipeline_mode = #tpu.pipeline_mode<synchronous>, transform_indices = @transform_2, window_bounds = array<i64: 1, 64>}, {pipeline_mode = #tpu.pipeline_mode<synchronous>, transform_indices = @transform_3, window_bounds = array<i64: 64, 64>}, {pipeline_mode = #tpu.pipeline_mode<synchronous>, transform_indices = @transform_4, window_bounds = array<i64: 1, 64>}, {pipeline_mode = #tpu.pipeline_mode<synchronous>, transform_indices = @transform_5, window_bounds = array<i64: 64, 128>}, {pipeline_mode = #tpu.pipeline_mode<synchronous>, transform_indices = @transform_6, window_bounds = array<i64: 1, 128>}, {transform_indices = @transform_7, window_bounds = array<i64: 8, 128>}]} {
    %c0 = arith.constant 0 : index
    %c0_0 = arith.constant 0 : index
    %0 = vector.load %arg1[%c0, %c0_0] : memref<8x4xf32, #tpu.memory_space<vmem>>, vector<8x4xf32>
    %1 = vector.extract_strided_slice %0 {offsets = [0, 3], sizes = [8, 1], strides = [1, 1]} : vector<8x4xf32> to vector<8x1xf32>
    %2 = arith.truncf %0 : vector<8x4xf32> to vector<8x4xbf16>
    %c0_1 = arith.constant 0 : index
    %c0_2 = arith.constant 0 : index
    %3 = vector.load %arg2[%c0_1, %c0_2] : memref<4x64xbf16, #tpu.memory_space<vmem>>, vector<4x64xbf16>
    %cst = arith.constant dense<0.000000e+00> : vector<8x64xf32>
    %4 = tpu.matmul %2, %3, %cst {dimension_numbers = #tpu.dot_dimension_numbers<[1], [0], [0], [1], [0, 0, 1, 1], [], []>} : vector<8x4xbf16>, vector<4x64xbf16>, vector<8x64xf32> -> vector<8x64xf32>
    %c0_3 = arith.constant 0 : index
    %c0_4 = arith.constant 0 : index
    %5 = vector.load %arg3[%c0_3, %c0_4] : memref<1x64xf32, #tpu.memory_space<vmem>>, vector<1x64xf32>
    %6 = vector.broadcast %5 : vector<1x64xf32> to vector<8x64xf32>
    %7 = arith.addf %4, %6 : vector<8x64xf32>
    %cst_5 = arith.constant 0.000000e+00 : f32
    %8 = vector.broadcast %cst_5 : f32 to vector<8x64xf32>
    %9 = arith.maximumf %7, %8 : vector<8x64xf32>
    %10 = arith.truncf %9 : vector<8x64xf32> to vector<8x64xbf16>
    %c0_6 = arith.constant 0 : index
    %c0_7 = arith.constant 0 : index
    %11 = vector.load %arg4[%c0_6, %c0_7] : memref<64x64xbf16, #tpu.memory_space<vmem>>, vector<64x64xbf16>
    %cst_8 = arith.constant dense<0.000000e+00> : vector<8x64xf32>
    %12 = tpu.matmul %10, %11, %cst_8 {dimension_numbers = #tpu.dot_dimension_numbers<[1], [0], [0], [1], [0, 0, 1, 1], [], []>} : vector<8x64xbf16>, vector<64x64xbf16>, vector<8x64xf32> -> vector<8x64xf32>
    %c0_9 = arith.constant 0 : index
    %c0_10 = arith.constant 0 : index
    %13 = vector.load %arg5[%c0_9, %c0_10] : memref<1x64xf32, #tpu.memory_space<vmem>>, vector<1x64xf32>
    %14 = vector.broadcast %13 : vector<1x64xf32> to vector<8x64xf32>
    %15 = arith.addf %12, %14 : vector<8x64xf32>
    %cst_11 = arith.constant 0.000000e+00 : f32
    %16 = vector.broadcast %cst_11 : f32 to vector<8x64xf32>
    %17 = arith.maximumf %15, %16 : vector<8x64xf32>
    %18 = arith.truncf %17 : vector<8x64xf32> to vector<8x64xbf16>
    %c0_12 = arith.constant 0 : index
    %c0_13 = arith.constant 0 : index
    %19 = vector.load %arg6[%c0_12, %c0_13] : memref<64x128xbf16, #tpu.memory_space<vmem>>, vector<64x128xbf16>
    %cst_14 = arith.constant dense<0.000000e+00> : vector<8x128xf32>
    %20 = tpu.matmul %18, %19, %cst_14 {dimension_numbers = #tpu.dot_dimension_numbers<[1], [0], [0], [1], [0, 0, 1, 1], [], []>} : vector<8x64xbf16>, vector<64x128xbf16>, vector<8x128xf32> -> vector<8x128xf32>
    %c0_15 = arith.constant 0 : index
    %c0_16 = arith.constant 0 : index
    %21 = vector.load %arg7[%c0_15, %c0_16] : memref<1x128xf32, #tpu.memory_space<vmem>>, vector<1x128xf32>
    %22 = vector.broadcast %21 : vector<1x128xf32> to vector<8x128xf32>
    %23 = arith.addf %20, %22 : vector<8x128xf32>
    %24 = tpu.iota {dimensions = array<i32: 1>} : vector<8x128xi32>
    %cst_17 = arith.constant 0.000000e+00 : f32
    %25 = vector.broadcast %cst_17 : f32 to vector<8x128xf32>
    %26 = arith.maximumf %23, %25 : vector<8x128xf32>
    %27 = vector.broadcast %cst_17 : f32 to vector<8x128xf32>
    %28 = arith.subf %23, %27 : vector<8x128xf32>
    %29 = arith.cmpf one, %28, %28 : vector<8x128xf32>
    %30 = vector.broadcast %cst_17 : f32 to vector<8x128xf32>
    %31 = arith.addf %23, %30 : vector<8x128xf32>
    %32 = math.absf %28 : vector<8x128xf32>
    %cst_18 = arith.constant 0.000000e+00 : f32
    %33 = vector.broadcast %cst_18 : f32 to vector<8x128xf32>
    %34 = arith.subf %33, %32 : vector<8x128xf32>
    %35 = math.exp %34 : vector<8x128xf32>
    %36 = math.log1p %35 : vector<8x128xf32>
    %37 = arith.addf %26, %36 : vector<8x128xf32>
    %38 = arith.select %29, %31, %37 : vector<8x128xi1>, vector<8x128xf32>
    %39 = vector.broadcast %1 : vector<8x1xf32> to vector<8x128xf32>
    %40 = arith.mulf %38, %39 : vector<8x128xf32>
    %c5_i32 = arith.constant 5 : i32
    %41 = vector.broadcast %c5_i32 : i32 to vector<8x128xi32>
    %42 = arith.cmpi slt, %24, %41 : vector<8x128xi32>
    %c5_i32_19 = arith.constant 5 : i32
    %43 = vector.broadcast %c5_i32_19 : i32 to vector<8x128xi32>
    %44 = arith.cmpi eq, %24, %43 : vector<8x128xi32>
    %cst_20 = arith.constant 0.000000e+00 : f32
    %45 = vector.broadcast %cst_20 : f32 to vector<8x128xf32>
    %46 = arith.select %44, %40, %45 : vector<8x128xi1>, vector<8x128xf32>
    %47 = arith.select %42, %23, %46 : vector<8x128xi1>, vector<8x128xf32>
    %c0_21 = arith.constant 0 : index
    %c0_22 = arith.constant 0 : index
    %48 = vector.load %arg8[%c0_21, %c0_22] : memref<8x128xf32, #tpu.memory_space<vmem>>, vector<8x128xf32>
    tpu.vector_store %arg8[%c0_21, %c0_22], %47 {strides = array<i32>} : memref<8x128xf32, #tpu.memory_space<vmem>>, vector<8x128xf32>,
    return
  }
  func.func @transform_0(%arg0: i32) -> (i32, i32) {
    %c0_i32 = arith.constant 0 : i32
    %c0_i32_0 = arith.constant 0 : i32
    return %arg0, %c0_i32 : i32, i32
  }
  func.func @transform_1(%arg0: i32) -> (i32, i32) {
    %c0_i32 = arith.constant 0 : i32
    %c0_i32_0 = arith.constant 0 : i32
    %c0_i32_1 = arith.constant 0 : i32
    return %c0_i32, %c0_i32_0 : i32, i32
  }
  func.func @transform_2(%arg0: i32) -> (i32, i32) {
    %c0_i32 = arith.constant 0 : i32
    %c0_i32_0 = arith.constant 0 : i32
    %c0_i32_1 = arith.constant 0 : i32
    return %c0_i32, %c0_i32_0 : i32, i32
  }
  func.func @transform_3(%arg0: i32) -> (i32, i32) {
    %c0_i32 = arith.constant 0 : i32
    %c0_i32_0 = arith.constant 0 : i32
    %c0_i32_1 = arith.constant 0 : i32
    return %c0_i32, %c0_i32_0 : i32, i32
  }
  func.func @transform_4(%arg0: i32) -> (i32, i32) {
    %c0_i32 = arith.constant 0 : i32
    %c0_i32_0 = arith.constant 0 : i32
    %c0_i32_1 = arith.constant 0 : i32
    return %c0_i32, %c0_i32_0 : i32, i32
  }
  func.func @transform_5(%arg0: i32) -> (i32, i32) {
    %c0_i32 = arith.constant 0 : i32
    %c0_i32_0 = arith.constant 0 : i32
    %c0_i32_1 = arith.constant 0 : i32
    return %c0_i32, %c0_i32_0 : i32, i32
  }
  func.func @transform_6(%arg0: i32) -> (i32, i32) {
    %c0_i32 = arith.constant 0 : i32
    %c0_i32_0 = arith.constant 0 : i32
    %c0_i32_1 = arith.constant 0 : i32
    return %c0_i32, %c0_i32_0 : i32, i32
  }
  func.func @transform_7(%arg0: i32) -> (i32, i32) {
    %c0_i32 = arith.constant 0 : i32
    %c0_i32_0 = arith.constant 0 : i32
    return %arg0, %c0_i32 : i32, i32
  }
}

</mosaic_0001>

<bundles_post_ra>
// kernel: tpu_custom_call.1
= control target key start
LH: loop header
LB: loop body
LE: loop exit
PB: predicated region body
PF: predicated region fallthrough
CT: control target
= control target key end

     0   :  { %12 = vsyncpa [#allocation3], 0  ;;  %s550_s0 = inlined_call_operand.vmem [shape: f32[8,4], index: 0, kind: input, shape index: {}]   ;;  %s551_s1 = inlined_call_operand.vmem [shape: bf16[4,64], index: 1, kind: input, shape index: {}]   ;;  %s552_s2 = inlined_call_operand.vmem [shape: f32[1,64], index: 2, kind: input, shape index: {}]   ;;  %s553_s3 = inlined_call_operand.hbm [shape: bf16[64,64], index: 3, kind: input, shape index: {}]   ;;  %s554_s4 = inlined_call_operand.vmem [shape: f32[1,64], index: 4, kind: input, shape index: {}]   ;;  %s555_s5 = inlined_call_operand.hbm [shape: bf16[64,128], index: 5, kind: input, shape index: {}]   ;;  %s556_s6 = inlined_call_operand.vmem [shape: f32[1,128], index: 6, kind: input, shape index: {}]   ;;  %s557_s7 = inlined_call_operand.hbm [shape: f32[8,128], index: 7, kind: output, shape index: {}]  }
   0x1   :  { %13 = vsyncpa [#allocation6], 0 }
   0x2   :  { %14 = vsyncpa [#allocation4], 0  ;;  %s473_s24 = smov [#allocation2]  }
   0x3   :  { %s26_s25 = sshll.u32 %s473_s24, 4  ;;  %s27_s25 = int_to_ptr.vmem [resolvable:$true] %s26_s25 }
   0x4   :  { %s415_s26 = scalar_lea.vmem %s27_s25, 512  ;;  %p420_p1 = scmp.lt.s32.totalorder %s27_s25, %s27_s25 }
   0x5   :  { %p416_p0 = scmp.ne.s32.totalorder %s27_s25, %s415_s26  ;;  %p421_p2 = scmp.lt.s32.totalorder %s415_s26, %s415_s26 }
   0x7   :  { %p422_p3 = por %p421_p2, %p420_p1 }
   0x9   :  { %p423_p4 = pnand %p422_p3, %p416_p0 }
   0xb   :  { %426 = shalt.err (!%p423_p4)
}
   0xc   :  { %s474_s27 = smov 64   ;;  %s475_s28 = smov 4  }
   0xd   :  { %32 = dma.hbm_to_vmem [thread:$0]  %s553_s3, 512, %s27_s25, [#allocation3], %s474_s27, %s474_s27, %s475_s28  }
   0xe   :  { %s476_s8 = smov [#allocation5]  }
   0xf   :  { %s40_s9 = sshll.u32 %s476_s8, 4  ;;  %s41_s9 = int_to_ptr.vmem [resolvable:$true] %s40_s9 }
  0x10   :  { %s435_s10 = scalar_lea.vmem %s41_s9, 512  ;;  %p440_p6 = scmp.lt.s32.totalorder %s41_s9, %s41_s9 }
  0x11   :  { %p436_p5 = scmp.ne.s32.totalorder %s41_s9, %s435_s10  ;;  %p441_p7 = scmp.lt.s32.totalorder %s435_s10, %s435_s10 }
  0x13   :  { %p442_p8 = por %p441_p7, %p440_p6 }
  0x15   :  { %p443_p9 = pnand %p442_p8, %p436_p5 }
  0x17   :  { %446 = shalt.err (!%p443_p9)
}
  0x18   :  { %46 = dma.hbm_to_vmem [thread:$0]  %s555_s5, 512, %s41_s9, [#allocation6], %s474_s27, %s474_s27, %s475_s28  }
  0x19   :  { %467 = dma.done.wait [#allocation3], 512  }
  0x1a   :  { %468 = vsyncadd [#allocation3], 4294966784 }
  0x1b   :  { %469 = dma.done.wait [#allocation6], 512  }
  0x1c   :  { %470 = vsyncadd [#allocation6], 4294966784  ;;  %v477_v0 = vmov 0.0   ;;  %vm478_vm0 = vmmov 0   ;;  %vm70_vm1 = vcmask 1041408   ;;  %v56_v2 = vld [vmem:[%s550_s0] sm:$0xff]  ;;  %v283_v43 = vlaneseq }
  0x1d   :  { %356 = vmatprep.subr.bf16.mxu0 %v477_v0  ;;  %358 = vmatprep.mubr.msk.bf16.mxu0 %vm478_vm0, %v477_v0  ;;  %v58_v1 = vld [vmem:[%s551_s1] sm:$0x3]  ;;  %v57_v4 = vpack.c.bf16 %v56_v2, %v56_v2  ;;  %v395_v5 = vld [vmem:[#allocation2 + $0x18] sm:$0xff]   ;;  %vm66_vm2 = vcmask 31744   ;;  %v396_v6 = vld [vmem:[#allocation2 + $0x10] sm:$0xff]   ;;  %vm155_vm3 = vcmask 523264  }
  0x1e   :  { %362 = vmatprep.subr.bf16.mxu1 %v477_v0  ;;  %370 = vmatprep.mubr.msk.bf16.mxu1 %vm478_vm0, %v477_v0  ;;  %v72_v3 = vsel %vm70_vm1, %v58_v1, 0  ;;  %v397_v7 = vld [vmem:[#allocation2 + $0x8] sm:$0xff]   ;;  %v398_v8 = vld [vmem:[#allocation2] sm:$0xff]   ;;  %v399_v9 = vld [vmem:[#allocation5 + $0x18] sm:$0xff]   ;;  %v479_v21 = vmov 3   ;;  %v284_v48 = vand.u32 127, %v283_v43 }
  0x1f   :  { %357 = vmatpush3.bf16.msra.mxu0 %v72_v3  ;;  %363 = vmatpush3.bf16.msra.mxu1 %v395_v5  ;;  %v400_v10 = vld [vmem:[#allocation5 + $0x10] sm:$0xff]   ;;  %v330_v11 = vld [vmem:[%s552_s2] ss:$0 sm:$0xff]  ;;  %v401_v19 = vld [vmem:[#allocation5 + $0x8] sm:$0xff]  }
  0x20   :  { %374 = vmatprep.subr.bf16.mxu0 %v477_v0  ;;  %364 = vmatprep.subr.bf16.mxu1 %v477_v0  ;;  %v402_v20 = vld [vmem:[#allocation5] sm:$0xff]   ;;  %vm310_vm6 = vcmp.eq.s32.totalorder %v284_v48, 5  ;;  %vm309_vm7 = vcmp.lt.s32.totalorder %v284_v48, 5 }
  0x21   :  { %394 = vset.pattern.permute.xlu0 %v479_v21  ;;  %v332_v22 = vld [vmem:[%s554_s4] ss:$0 sm:$0xff]  ;;  %s480_s4 = smov [#allocation7]  }
  0x22   :  { %359 = vmatmul.mubr.msk.bf16.vlgmr.msra.gmra.mxu0 %vm66_vm2, %v57_v4  ;;  %305 = vperm.xlu0 %394, %v56_v2   ;;  %v338_v30 = vld [vmem:[%s556_s6] ss:$0 sm:$0xff]  ;;  %s320_s6 = sshll.u32 %s480_s4, 4  ;;  %s321_s6 = int_to_ptr.vmem [resolvable:$true] %s320_s6 }
  0x23   :  { %382 = vmatprep.mubr.msk.bf16.mxu0 %vm478_vm0, %v477_v0  ;;  %365 = vmatpush3.bf16.msra.mxu1 %v396_v6  ;;  %s447_s18 = scalar_lea.vmem %s321_s6, 128  ;;  %p452_p11 = scmp.lt.s32.totalorder %s321_s6, %s321_s6 }
  0x24   :  { %366 = vmatprep.subr.bf16.mxu1 %v477_v0  ;;  %375 = vmatpush3.bf16.msra.mxu0 %v399_v9  ;;  %p448_p10 = scmp.ne.s32.totalorder %s321_s6, %s447_s18  ;;  %p453_p12 = scmp.lt.s32.totalorder %s447_s18, %s447_s18 }
  0x25   :  { %376 = vmatprep.subr.bf16.mxu0 %v477_v0 }
  0x26   :  { %p454_p13 = por %p453_p12, %p452_p11 }
  0x27   :  { %367 = vmatpush3.bf16.msra.mxu1 %v397_v7 }
  0x28   :  { %368 = vmatprep.subr.bf16.mxu1 %v477_v0  ;;  %377 = vmatpush3.bf16.msra.mxu0 %v400_v10  ;;  %p455_p0 = pnand %p454_p13, %p448_p10 }
  0x29   :  { %378 = vmatprep.subr.bf16.mxu0 %v477_v0 }
  0x2b   :  { %369 = vmatpush3.bf16.msra.mxu1 %v398_v8 }
  0x2c   :  { %379 = vmatpush3.bf16.msra.mxu0 %v401_v19 }
  0x2d   :  { %380 = vmatprep.subr.bf16.mxu0 %v477_v0 }
  0x30   :  { %381 = vmatpush3.bf16.msra.mxu0 %v402_v20 }
  0x9d   :  { %v306_v51 = vpop.permute.xlu0 %305 }
  0xe2   :  { %v108_v12 = vpop.f32.mrf.mxu0 }
  0xe3   :  { %v109_v13 = vadd.f32 %v330_v11, %v108_v12 }
  0xe4   :  { %v360_v14 = vpop.f32.mrf.mxu0 }
  0xe5   :  { %v114_v15 = vmax.f32 %v109_v13, 0.0 }
  0xe6   :  { %v111_v16 = vpop.f32.mrf.mxu0 }
  0xe7   :  { %v115_v17 = vpack.c.bf16 %v114_v15, %v114_v15 }
  0xe8   :  { %v361_v18 = vpop.f32.mrf.mxu0 }
  0xe9   :  { %371 = vmatmul.mubr.msk.bf16.vlgmr.msra.gmra.mxu1 %vm155_vm3, %v115_v17 }
 0x1a9   :  { %v193_v23 = vpop.f32.mrf.mxu1 }
 0x1aa   :  { %v194_v24 = vadd.f32 %v332_v22, %v193_v23 }
 0x1ab   :  { %v372_v25 = vpop.f32.mrf.mxu1 }
 0x1ac   :  { %v199_v26 = vmax.f32 %v194_v24, 0.0 }
 0x1ad   :  { %v196_v27 = vpop.f32.mrf.mxu1 }
 0x1ae   :  { %v200_v28 = vpack.c.bf16 %v199_v26, %v199_v26 }
 0x1af   :  { %v373_v29 = vpop.f32.mrf.mxu1 }
 0x1b0   :  { %383 = vmatmul.mubr.msk.bf16.vlgmr.msra.gmra.mxu0 %vm155_vm3, %v200_v28 }
 0x270   :  { %v277_v31 = vpop.f32.mrf.mxu0 }
 0x271   :  { %v278_v32 = vadd.f32 %v338_v30, %v277_v31 }
 0x272   :  { %v384_v33 = vpop.f32.mrf.mxu0 }
 0x273   :  { %v288_v34 = vand.u32 2147483647, %v278_v32  ;;  %v285_v49 = vmax.f32 %v278_v32, 0.0  ;;  %vm286_vm5 = vcmp.ne.f32.partialorder %v278_v32, %v278_v32 }
 0x274   :  { %v280_v35 = vpop.f32.mrf.mxu0 }
 0x275   :  { %v289_v36 = vsub.f32 0.0, %v288_v34 }
 0x276   :  { %v385_v37 = vpop.f32.mrf.mxu0 }
 0x277   :  { %v290_v38 = vmul.f32 1.442695, %v289_v36 }
 0x279   :  { %403 = vpow2.f32 %v290_v38 }
 0x286   :  { %v404_v39 = vpop.eup %403 }
 0x287   :  { %v292_v40 = vadd.f32 1.0, %v404_v39  ;;  %v295_v41 = vmul.f32 -0.5, %v404_v39  ;;  %v298_v44 = vand.u32 2147483647, %v404_v39 }
 0x289   :  { %405 = vlog2.f32 %v292_v40  ;;  %v296_v42 = vadd.f32 1.0, %v295_v41  ;;  %vm299_vm4 = vcmp.lt.f32.partialorder %v298_v44, 0.0004427343 }
 0x28b   :  { %v297_v47 = vmul.f32 %v404_v39, %v296_v42 }
 0x296   :  { %v406_v45 = vpop.eup %405 }
 0x297   :  { %v294_v46 = vmul.f32 0.6931472, %v406_v45 }
 0x299   :  { %v300_v50 = vsel %vm299_vm4, %v297_v47, %v294_v46 }
 0x29a   :  { %v301_v52 = vadd.f32 %v300_v50, %v285_v49 }
 0x29c   :  { %v302_v53 = vsel %vm286_vm5, %v278_v32, %v301_v52 }
 0x29d   :  { %v308_v54 = vmul.f32 %v306_v51, %v302_v53 }
 0x29f   :  { %v311_v55 = vsel %vm310_vm6, %v308_v54, 0.0 }
 0x2a0   :  { %v312_v56 = vsel %vm309_vm7, %v278_v32, %v311_v55 }
 0x2a1   :  { %313 = vst [vmem:[#allocation7] sm:$0xff] %v312_v56 }
 0x2a2   :  { %458 = shalt.err (!%p455_p0)
}
 0x2a3   :  { %323 = dma.vmem_to_hbm [thread:$0]  %s321_s6, 128, %s557_s7, [#allocation4]  }
 0x2a4   :  { %471 = dma.done.wait [#allocation4], 128  }
 0x2a5   :  { %472 = vsyncadd [#allocation4], 4294967168 }
 0x2a6   :  { %327 = vsyncpa [#allocation3], 1 }
 0x2a7   :  { %328 = vsyncpa [#allocation6], 1 }
 0x2a8   :  { %329 = vsyncpa [#allocation4], 1 }

</bundles_post_ra>
